<compile_context>
chip_gen: v6e
topology: v6e:2x2x1
jax: 0.10.0
libtpu: 0.0.40
codegen_flags: <defaults>
</compile_context>

<pallas_src>
import math
import jax
import jax.numpy as jnp
from jax.experimental import pallas as pl
from jax.experimental.pallas import tpu as pltpu

LANE = 128        # TPU lane width: last-dim alignment target.
SUBLANE = 16      # sublane alignment for bf16 tiles (packed 2 rows / sublane).
TILE_CAP = 1024   # max batch-tile rows (per-tile VMEM ~1-3 MiB at this size).


def _round_up(n, m):
    return ((n + m - 1) // m) * m


def _cdiv(a, b):
    return (a + b - 1) // b


def qnet_kernel(x_ref, w1_ref, b1_ref, w2_ref, b2_ref, w3_ref, b3_ref, o_ref):
    # All three matmuls + bias + ReLU fused; MXU (bf16 operands, f32 accumulation)
    # for the dots, VPU (f32) for bias add / ReLU.
    x = x_ref[...]                                                   # bf16 already
    h1 = jnp.dot(x, w1_ref[...], preferred_element_type=jnp.float32) + b1_ref[...]
    h1 = jnp.maximum(h1, 0.0).astype(jnp.bfloat16)
    h2 = jnp.dot(h1, w2_ref[...], preferred_element_type=jnp.float32) + b2_ref[...]
    h2 = jnp.maximum(h2, 0.0).astype(jnp.bfloat16)
    o_ref[...] = (jnp.dot(h2, w3_ref[...], preferred_element_type=jnp.float32)
                  + b3_ref[...]).astype(o_ref.dtype)                 # bf16 lane-dense store


def _pick_tiles(B, batch_tile):
    """Balanced batch tiling: minimizes padding, guarantees >=2 tiles for non-trivial B
    (v7x megacore), prefers an even tile count, clamps to TILE_CAP."""
    if batch_tile is not None:
        tb = min(_round_up(batch_tile, SUBLANE), TILE_CAP)
        num_tiles = _cdiv(B, tb)
        return tb, num_tiles
    num_tiles = _cdiv(B, TILE_CAP)
    if B >= 64:
        num_tiles = max(num_tiles, 2)          # keep both v7x TensorCores busy
    if num_tiles > 1 and num_tiles % 2:
        num_tiles += 1                         # even tile count -> balanced 2-TC split
    tb = _round_up(_cdiv(B, num_tiles), SUBLANE)
    return tb, num_tiles


def qnet_forward(x, params, output_dim, *, batch_tile=None):
    """x: (B, input_dim) float32 (or bf16).  params: bf16 w1/w2/w3 (in,out layout; w3
    lane-padded) and f32 b1/b2/b3 (b3 lane-padded).  Returns (B, output_dim) float32."""
    B, in_dim = x.shape
    hid = params["w1"].shape[1]
    out_pad = params["w3"].shape[1]                 # lane-padded, multiple of 128

    tb, num_tiles = _pick_tiles(B, batch_tile)
    Bp = num_tiles * tb                             # padding < SUBLANE rows per tile

    # Cast once in the wrapper (halves the x HBM read vs streaming f32) and pad ragged rows.
    x = x.astype(jnp.bfloat16)
    if Bp != B:
        x = jnp.pad(x, ((0, Bp - B), (0, 0)))

    # Weights/biases: single full-extent block with a constant index_map, so Pallas fetches
    # them once and reuses them across every batch tile.
    w_spec = lambda shape: pl.BlockSpec(shape, lambda i: (0, 0))

    flops = 2 * Bp * (in_dim * hid + hid * hid + hid * out_pad)
    bytes_accessed = (Bp * in_dim * 2                                    # x (bf16)
                      + (in_dim * hid + hid * hid + hid * out_pad) * 2   # weights (bf16)
                      + (2 * hid + out_pad) * 4                          # biases (f32)
                      + Bp * out_pad * 2)                                # output (bf16)

    out = pl.pallas_call(
        qnet_kernel,
        out_shape=jax.ShapeDtypeStruct((Bp, out_pad), jnp.bfloat16),
        grid_spec=pltpu.PrefetchScalarGridSpec(
            num_scalar_prefetch=0,
            grid=(num_tiles,),
            in_specs=[
                pl.BlockSpec((tb, in_dim), lambda i: (i, 0)),   # x tile (streamed, bf16)
                w_spec((in_dim, hid)),                          # w1 (bf16)
                w_spec((1, hid)),                               # b1 (f32)
                w_spec((hid, hid)),                             # w2 (bf16)
                w_spec((1, hid)),                               # b2 (f32)
                w_spec((hid, out_pad)),                         # w3 (bf16, lane-padded)
                w_spec((1, out_pad)),                           # b3 (f32, lane-padded)
            ],
            out_specs=pl.BlockSpec((tb, out_pad), lambda i: (i, 0)),
        ),
        compiler_params=pltpu.CompilerParams(
            # Independent batch tiles -> megacore / 2-TC sharding on v7x.
            dimension_semantics=("parallel",)),
        cost_estimate=pl.CostEstimate(
            flops=flops, transcendentals=0, bytes_accessed=bytes_accessed),
    )(x, params["w1"], params["b1"], params["w2"], params["b2"],
      params["w3"], params["b3"])

    return out[:B, :output_dim].astype(jnp.float32)


def init_qnet_params(key, input_dim, output_dim, hidden=128):
    """Mirrors torch.nn.Linear default init: U(-1/sqrt(fan_in), 1/sqrt(fan_in)).
    Weights cast to bf16 (MXU-native); last layer zero-padded to a lane-dense width."""
    ks = jax.random.split(key, 6)

    def lin(kw, kb, fan_in, fan_out, pad_to=None):
        bound = 1.0 / math.sqrt(fan_in)
        w = jax.random.uniform(kw, (fan_in, fan_out), jnp.float32, -bound, bound)
        b = jax.random.uniform(kb, (1, fan_out), jnp.float32, -bound, bound)
        if pad_to is not None and pad_to > fan_out:
            w = jnp.pad(w, ((0, 0), (0, pad_to - fan_out)))
            b = jnp.pad(b, ((0, 0), (0, pad_to - fan_out)))
        return w, b

    out_pad = _round_up(output_dim, LANE)
    w1, b1 = lin(ks[0], ks[1], input_dim, hidden)
    w2, b2 = lin(ks[2], ks[3], hidden, hidden)
    w3, b3 = lin(ks[4], ks[5], hidden, output_dim, pad_to=out_pad)
    return dict(w1=w1.astype(jnp.bfloat16), b1=b1,
                w2=w2.astype(jnp.bfloat16), b2=b2,
                w3=w3.astype(jnp.bfloat16), b3=b3)


def qnet_reference(x, p, output_dim):
    """Pure-JAX reference with identical bf16-operand / f32-accumulation / bf16-store numerics.
    Note: bf16 weights + bf16 output deviate from an exact f32 PyTorch QNet (fine for DQN)."""
    h1 = jnp.maximum(
        jnp.dot(x.astype(jnp.bfloat16), p["w1"],
                preferred_element_type=jnp.float32) + p["b1"], 0.0)
    h2 = jnp.maximum(
        jnp.dot(h1.astype(jnp.bfloat16), p["w2"],
                preferred_element_type=jnp.float32) + p["b2"], 0.0)
    out = jnp.dot(h2.astype(jnp.bfloat16), p["w3"],
                  preferred_element_type=jnp.float32) + p["b3"]
    return out.astype(jnp.bfloat16).astype(jnp.float32)[:, :output_dim]


if __name__ == "__main__":
    key = jax.random.PRNGKey(0)
    k_x, k_p = jax.random.split(key)

    batch, input_dim, output_dim = 8, 16, 4
    x = jax.random.normal(k_x, (batch, input_dim), jnp.float32)
    params = init_qnet_params(k_p, input_dim, output_dim)

    out = jax.block_until_ready(qnet_forward(x, params, output_dim))
    ref = qnet_reference(x, params, output_dim)
    assert out.shape == (batch, output_dim)
    assert jnp.allclose(out, ref, atol=1e-2, rtol=1e-2), float(jnp.max(jnp.abs(out - ref)))

    # Ragged batch + explicit small tile override (multi-step pipelined grid).
    x2 = jax.random.normal(k_x, (72, input_dim), jnp.float32)     # 72 % 16 != 0 -> padded
    out2 = jax.block_until_ready(qnet_forward(x2, params, output_dim, batch_tile=16))
    ref2 = qnet_reference(x2, params, output_dim)
    assert out2.shape == (72, output_dim)
    assert jnp.allclose(out2, ref2, atol=1e-2, rtol=1e-2)

    # Default (balanced) tiling path: B=300 -> 2 tiles of 160 rows (>=2 tiles for v7x).
    x3 = jax.random.normal(k_x, (300, input_dim), jnp.float32)
    out3 = jax.block_until_ready(qnet_forward(x3, params, output_dim))
    ref3 = qnet_reference(x3, params, output_dim)
    assert out3.shape == (300, output_dim)
    assert jnp.allclose(out3, ref3, atol=1e-2, rtol=1e-2)

    print("KERNEL_OK")
</pallas_src>

<mosaic_0001>
module attributes {stable_mosaic.version = 11 : i64} {
  func.func @qnet_kernel(%arg0: i32, %arg1: memref<16x16xbf16, #tpu.memory_space<vmem>>, %arg2: memref<16x128xbf16, #tpu.memory_space<vmem>>, %arg3: memref<1x128xf32, #tpu.memory_space<vmem>>, %arg4: memref<128x128xbf16, #tpu.memory_space<vmem>>, %arg5: memref<1x128xf32, #tpu.memory_space<vmem>>, %arg6: memref<128x128xbf16, #tpu.memory_space<vmem>>, %arg7: memref<1x128xf32, #tpu.memory_space<vmem>>, %arg8: memref<16x128xbf16, #tpu.memory_space<vmem>>) attributes {dimension_semantics = [#tpu.dimension_semantics<parallel>], iteration_bounds = array<i64: 1>, scalar_prefetch = 0 : i64, scratch_operands = 0 : i64, tpu.core_type = #tpu.core_type<tc>, window_params = [{transform_indices = @transform_0, window_bounds = array<i64: 16, 16>}, {pipeline_mode = #tpu.pipeline_mode<synchronous>, transform_indices = @transform_1, window_bounds = array<i64: 16, 128>}, {pipeline_mode = #tpu.pipeline_mode<synchronous>, transform_indices = @transform_2, window_bounds = array<i64: 1, 128>}, {pipeline_mode = #tpu.pipeline_mode<synchronous>, transform_indices = @transform_3, window_bounds = array<i64: 128, 128>}, {pipeline_mode = #tpu.pipeline_mode<synchronous>, transform_indices = @transform_4, window_bounds = array<i64: 1, 128>}, {pipeline_mode = #tpu.pipeline_mode<synchronous>, transform_indices = @transform_5, window_bounds = array<i64: 128, 128>}, {pipeline_mode = #tpu.pipeline_mode<synchronous>, transform_indices = @transform_6, window_bounds = array<i64: 1, 128>}, {transform_indices = @transform_7, window_bounds = array<i64: 16, 128>}]} {
    %c0 = arith.constant 0 : index
    %c0_0 = arith.constant 0 : index
    %0 = vector.load %arg1[%c0, %c0_0] : memref<16x16xbf16, #tpu.memory_space<vmem>>, vector<16x16xbf16>
    %c0_1 = arith.constant 0 : index
    %c0_2 = arith.constant 0 : index
    %1 = vector.load %arg2[%c0_1, %c0_2] : memref<16x128xbf16, #tpu.memory_space<vmem>>, vector<16x128xbf16>
    %cst = arith.constant dense<0.000000e+00> : vector<16x128xf32>
    %2 = tpu.matmul %0, %1, %cst {dimension_numbers = #tpu.dot_dimension_numbers<[1], [0], [0], [1], [0, 0, 1, 1], [], []>} : vector<16x16xbf16>, vector<16x128xbf16>, vector<16x128xf32> -> vector<16x128xf32>
    %c0_3 = arith.constant 0 : index
    %c0_4 = arith.constant 0 : index
    %3 = vector.load %arg3[%c0_3, %c0_4] : memref<1x128xf32, #tpu.memory_space<vmem>>, vector<1x128xf32>
    %4 = vector.broadcast %3 : vector<1x128xf32> to vector<16x128xf32>
    %5 = arith.addf %2, %4 : vector<16x128xf32>
    %cst_5 = arith.constant 0.000000e+00 : f32
    %6 = vector.broadcast %cst_5 : f32 to vector<16x128xf32>
    %7 = arith.maximumf %5, %6 : vector<16x128xf32>
    %8 = arith.truncf %7 : vector<16x128xf32> to vector<16x128xbf16>
    %c0_6 = arith.constant 0 : index
    %c0_7 = arith.constant 0 : index
    %9 = vector.load %arg4[%c0_6, %c0_7] : memref<128x128xbf16, #tpu.memory_space<vmem>>, vector<128x128xbf16>
    %cst_8 = arith.constant dense<0.000000e+00> : vector<16x128xf32>
    %10 = tpu.matmul %8, %9, %cst_8 {dimension_numbers = #tpu.dot_dimension_numbers<[1], [0], [0], [1], [0, 0, 1, 1], [], []>} : vector<16x128xbf16>, vector<128x128xbf16>, vector<16x128xf32> -> vector<16x128xf32>
    %c0_9 = arith.constant 0 : index
    %c0_10 = arith.constant 0 : index
    %11 = vector.load %arg5[%c0_9, %c0_10] : memref<1x128xf32, #tpu.memory_space<vmem>>, vector<1x128xf32>
    %12 = vector.broadcast %11 : vector<1x128xf32> to vector<16x128xf32>
    %13 = arith.addf %10, %12 : vector<16x128xf32>
    %cst_11 = arith.constant 0.000000e+00 : f32
    %14 = vector.broadcast %cst_11 : f32 to vector<16x128xf32>
    %15 = arith.maximumf %13, %14 : vector<16x128xf32>
    %16 = arith.truncf %15 : vector<16x128xf32> to vector<16x128xbf16>
    %c0_12 = arith.constant 0 : index
    %c0_13 = arith.constant 0 : index
    %17 = vector.load %arg6[%c0_12, %c0_13] : memref<128x128xbf16, #tpu.memory_space<vmem>>, vector<128x128xbf16>
    %cst_14 = arith.constant dense<0.000000e+00> : vector<16x128xf32>
    %18 = tpu.matmul %16, %17, %cst_14 {dimension_numbers = #tpu.dot_dimension_numbers<[1], [0], [0], [1], [0, 0, 1, 1], [], []>} : vector<16x128xbf16>, vector<128x128xbf16>, vector<16x128xf32> -> vector<16x128xf32>
    %c0_15 = arith.constant 0 : index
    %c0_16 = arith.constant 0 : index
    %19 = vector.load %arg7[%c0_15, %c0_16] : memref<1x128xf32, #tpu.memory_space<vmem>>, vector<1x128xf32>
    %20 = vector.broadcast %19 : vector<1x128xf32> to vector<16x128xf32>
    %21 = arith.addf %18, %20 : vector<16x128xf32>
    %22 = arith.truncf %21 : vector<16x128xf32> to vector<16x128xbf16>
    %c0_17 = arith.constant 0 : index
    %c0_18 = arith.constant 0 : index
    %23 = vector.load %arg8[%c0_17, %c0_18] : memref<16x128xbf16, #tpu.memory_space<vmem>>, vector<16x128xbf16>
    tpu.vector_store %arg8[%c0_17, %c0_18], %22 {strides = array<i32>} : memref<16x128xbf16, #tpu.memory_space<vmem>>, vector<16x128xbf16>,
    return
  }
  func.func @transform_0(%arg0: i32) -> (i32, i32) {
    %c0_i32 = arith.constant 0 : i32
    %c0_i32_0 = arith.constant 0 : i32
    return %arg0, %c0_i32 : i32, i32
  }
  func.func @transform_1(%arg0: i32) -> (i32, i32) {
    %c0_i32 = arith.constant 0 : i32
    %c0_i32_0 = arith.constant 0 : i32
    %c0_i32_1 = arith.constant 0 : i32
    return %c0_i32, %c0_i32_0 : i32, i32
  }
  func.func @transform_2(%arg0: i32) -> (i32, i32) {
    %c0_i32 = arith.constant 0 : i32
    %c0_i32_0 = arith.constant 0 : i32
    %c0_i32_1 = arith.constant 0 : i32
    return %c0_i32, %c0_i32_0 : i32, i32
  }
  func.func @transform_3(%arg0: i32) -> (i32, i32) {
    %c0_i32 = arith.constant 0 : i32
    %c0_i32_0 = arith.constant 0 : i32
    %c0_i32_1 = arith.constant 0 : i32
    return %c0_i32, %c0_i32_0 : i32, i32
  }
  func.func @transform_4(%arg0: i32) -> (i32, i32) {
    %c0_i32 = arith.constant 0 : i32
    %c0_i32_0 = arith.constant 0 : i32
    %c0_i32_1 = arith.constant 0 : i32
    return %c0_i32, %c0_i32_0 : i32, i32
  }
  func.func @transform_5(%arg0: i32) -> (i32, i32) {
    %c0_i32 = arith.constant 0 : i32
    %c0_i32_0 = arith.constant 0 : i32
    %c0_i32_1 = arith.constant 0 : i32
    return %c0_i32, %c0_i32_0 : i32, i32
  }
  func.func @transform_6(%arg0: i32) -> (i32, i32) {
    %c0_i32 = arith.constant 0 : i32
    %c0_i32_0 = arith.constant 0 : i32
    %c0_i32_1 = arith.constant 0 : i32
    return %c0_i32, %c0_i32_0 : i32, i32
  }
  func.func @transform_7(%arg0: i32) -> (i32, i32) {
    %c0_i32 = arith.constant 0 : i32
    %c0_i32_0 = arith.constant 0 : i32
    return %arg0, %c0_i32 : i32, i32
  }
}

</mosaic_0001>

<bundles_post_ra>
// kernel: tpu_custom_call.1
= control target key start
LH: loop header
LB: loop body
LE: loop exit
PB: predicated region body
PF: predicated region fallthrough
CT: control target
= control target key end

     0   :  { %12 = vsyncpa [#allocation3], 0  ;;  %s749_s0 = inlined_call_operand.hbm [shape: bf16[16,16], index: 0, kind: input, shape index: {}]   ;;  %s750_s1 = inlined_call_operand.hbm [shape: bf16[16,128], index: 1, kind: input, shape index: {}]   ;;  %s751_s2 = inlined_call_operand.vmem [shape: f32[1,128], index: 2, kind: input, shape index: {}]   ;;  %s752_s3 = inlined_call_operand.hbm [shape: bf16[128,128], index: 3, kind: input, shape index: {}]   ;;  %s753_s4 = inlined_call_operand.vmem [shape: f32[1,128], index: 4, kind: input, shape index: {}]   ;;  %s754_s5 = inlined_call_operand.hbm [shape: bf16[128,128], index: 5, kind: input, shape index: {}]   ;;  %s755_s6 = inlined_call_operand.vmem [shape: f32[1,128], index: 6, kind: input, shape index: {}]   ;;  %s756_s7 = inlined_call_operand.hbm [shape: bf16[16,128], index: 7, kind: output, shape index: {}]  }
   0x1   :  { %13 = vsyncpa [#allocation6], 0 }
   0x2   :  { %14 = vsyncpa [#allocation9], 0 }
   0x3   :  { %15 = vsyncpa [#allocation4], 0  ;;  %s641_s24 = smov [#allocation5]   ;;  %s642_s26 = smov [#allocation2]  }
   0x4   :  { %s33_s25 = sshll.u32 %s641_s24, 4  ;;  %s21_s27 = sshll.u32 %s642_s26, 4  ;;  %s34_s25 = int_to_ptr.vmem [resolvable:$true] %s33_s25  ;;  %s22_s27 = int_to_ptr.vmem [resolvable:$true] %s21_s27 }
   0x5   :  { %s541_s28 = scalar_lea.vmem %s34_s25, 128  ;;  %p546_p1 = scmp.lt.s32.totalorder %s34_s25, %s34_s25 }
   0x6   :  { %p542_p0 = scmp.ne.s32.totalorder %s34_s25, %s541_s28  ;;  %p547_p2 = scmp.lt.s32.totalorder %s541_s28, %s541_s28 }
   0x8   :  { %p548_p3 = por %p547_p2, %p546_p1 }
   0xa   :  { %p549_p4 = pnand %p548_p3, %p542_p0 }
   0xc   :  { %552 = shalt.err (!%p549_p4)
}
   0xd   :  { %s643_s29 = smov 64   ;;  %s644_s30 = smov 4  }
   0xe   :  { %39 = dma.hbm_to_vmem [thread:$0]  %s750_s1, 128, %s34_s25, [#allocation6], %s643_s29, %s643_s29, %s644_s30  }
   0xf   :  { %s561_s10 = scalar_lea.vmem %s22_s27, 128  ;;  %p566_p6 = scmp.lt.s32.totalorder %s22_s27, %s22_s27 }
  0x10   :  { %p562_p5 = scmp.ne.s32.totalorder %s22_s27, %s561_s10  ;;  %p567_p7 = scmp.lt.s32.totalorder %s561_s10, %s561_s10 }
  0x12   :  { %p568_p8 = por %p567_p7, %p566_p6 }
  0x14   :  { %p569_p9 = pnand %p568_p8, %p562_p5 }
  0x16   :  { %572 = shalt.err (!%p569_p9)
}
  0x17   :  { %27 = dma.hbm_to_vmem [thread:$0]  %s749_s0, 128, %s22_s27, [#allocation3], %s643_s29, %s643_s29, %s644_s30  }
  0x18   :  { %s645_s13 = smov [#allocation7]   ;;  %s646_s15 = smov [#allocation8]  }
  0x19   :  { %s47_s14 = sshll.u32 %s645_s13, 4  ;;  %s61_s16 = sshll.u32 %s646_s15, 4  ;;  %s48_s14 = int_to_ptr.vmem [resolvable:$true] %s47_s14  ;;  %s62_s16 = int_to_ptr.vmem [resolvable:$true] %s61_s16 }
  0x1a   :  { %s581_s1 = scalar_lea.vmem %s48_s14, 1024  ;;  %p586_p11 = scmp.lt.s32.totalorder %s48_s14, %s48_s14 }
  0x1b   :  { %p582_p10 = scmp.ne.s32.totalorder %s48_s14, %s581_s1  ;;  %p587_p12 = scmp.lt.s32.totalorder %s581_s1, %s581_s1 }
  0x1d   :  { %p588_p13 = por %p587_p12, %p586_p11 }
  0x1f   :  { %p589_p0 = pnand %p588_p13, %p582_p10 }
  0x21   :  { %592 = shalt.err (!%p589_p0)
}
  0x22   :  { %53 = dma.hbm_to_vmem [thread:$0]  %s752_s3, 1024, %s48_s14, [#allocation6], %s643_s29, %s643_s29, %s644_s30  }
  0x23   :  { %s601_s0 = scalar_lea.vmem %s62_s16, 1024  ;;  %p606_p2 = scmp.lt.s32.totalorder %s62_s16, %s62_s16 }
  0x24   :  { %p602_p1 = scmp.ne.s32.totalorder %s62_s16, %s601_s0  ;;  %p607_p3 = scmp.lt.s32.totalorder %s601_s0, %s601_s0 }
  0x26   :  { %p608_p4 = por %p607_p3, %p606_p2 }
  0x28   :  { %p609_p5 = pnand %p608_p4, %p602_p1 }
  0x2a   :  { %612 = shalt.err (!%p609_p5)
}
  0x2b   :  { %67 = dma.hbm_to_vmem [thread:$0]  %s754_s5, 1024, %s62_s16, [#allocation9], %s643_s29, %s643_s29, %s644_s30  }
  0x2c   :  { %633 = dma.done.wait [#allocation3], 128  }
  0x2d   :  { %634 = vsyncadd [#allocation3], 4294967168 }
  0x2e   :  { %635 = dma.done.wait [#allocation6], 1152  }
  0x2f   :  { %636 = vsyncadd [#allocation6], 4294966144 }
  0x30   :  { %637 = dma.done.wait [#allocation9], 1024  }
  0x31   :  { %638 = vsyncadd [#allocation9], 4294966272  ;;  %v647_v0 = vmov 0.0   ;;  %vm648_vm0 = vmmov 0   ;;  %v515_v1 = vld [vmem:[#allocation5] sm:$0xff]   ;;  %v516_v2 = vld [vmem:[#allocation2] sm:$0xff]  }
  0x32   :  { %460 = vmatprep.subr.bf16.mxu0 %v647_v0  ;;  %462 = vmatprep.mubr.msk.bf16.mxu0 %vm648_vm0, %v647_v0  ;;  %vm105_vm1 = vcmask 130048   ;;  %v517_v3 = vld [vmem:[#allocation7 + $0x38] sm:$0xff]   ;;  %v518_v4 = vld [vmem:[#allocation7 + $0x30] sm:$0xff]   ;;  %v519_v5 = vld [vmem:[#allocation7 + $0x28] sm:$0xff]   ;;  %s649_s24 = smov [#allocation10]  }
  0x33   :  { %466 = vmatprep.subr.bf16.mxu1 %v647_v0  ;;  %482 = vmatprep.mubr.msk.bf16.mxu1 %vm648_vm0, %v647_v0  ;;  %v520_v6 = vld [vmem:[#allocation7 + $0x20] sm:$0xff]   ;;  %v521_v7 = vld [vmem:[#allocation7 + $0x18] sm:$0xff]   ;;  %v522_v8 = vld [vmem:[#allocation7 + $0x10] sm:$0xff]   ;;  %s395_s25 = sshll.u32 %s649_s24, 4  ;;  %s396_s25 = int_to_ptr.vmem [resolvable:$true] %s395_s25 }
  0x34   :  { %461 = vmatpush3.bf16.msra.mxu0 %v515_v1  ;;  %467 = vmatpush3.bf16.msra.mxu1 %v517_v3  ;;  %v523_v9 = vld [vmem:[#allocation7 + $0x8] sm:$0xff]   ;;  %v524_v10 = vld [vmem:[#allocation7] sm:$0xff]   ;;  %v525_v11 = vld [vmem:[#allocation8 + $0x38] sm:$0xff]   ;;  %p618_p7 = scmp.lt.s32.totalorder %s396_s25, %s396_s25 }
  0x35   :  { %486 = vmatprep.subr.bf16.mxu0 %v647_v0  ;;  %468 = vmatprep.subr.bf16.mxu1 %v647_v0  ;;  %v526_v12 = vld [vmem:[#allocation8 + $0x30] sm:$0xff]   ;;  %v527_v13 = vld [vmem:[#allocation8 + $0x28] sm:$0xff]   ;;  %v528_v14 = vld [vmem:[#allocation8 + $0x20] sm:$0xff]  }
  0x36   :  { %v529_v15 = vld [vmem:[#allocation8 + $0x18] sm:$0xff]   ;;  %v409_v16 = vld [vmem:[%s751_s2] ss:$0 sm:$0xff]  ;;  %v531_v27 = vld [vmem:[#allocation8 + $0x8] sm:$0xff]  }
  0x37   :  { %463 = vmatmul.mubr.msk.bf16.vlgmr.msra.gmra.mxu0 %vm105_vm1, %v516_v2  ;;  %v530_v26 = vld [vmem:[#allocation8 + $0x10] sm:$0xff]   ;;  %v532_v28 = vld [vmem:[#allocation8] sm:$0xff]  }
  0x38   :  { %502 = vmatprep.mubr.msk.bf16.mxu0 %vm648_vm0, %v647_v0  ;;  %469 = vmatpush3.bf16.msra.mxu1 %v518_v4  ;;  %v413_v29 = vld [vmem:[%s753_s4] ss:$0 sm:$0xff]  ;;  %s613_s4 = scalar_lea.vmem %s396_s25, 128 }
  0x39   :  { %470 = vmatprep.subr.bf16.mxu1 %v647_v0  ;;  %487 = vmatpush3.bf16.msra.mxu0 %v525_v11  ;;  %v422_v40 = vld [vmem:[%s755_s6] ss:$0 sm:$0xff]  ;;  %p614_p6 = scmp.ne.s32.totalorder %s396_s25, %s613_s4  ;;  %p619_p8 = scmp.lt.s32.totalorder %s613_s4, %s613_s4 }
  0x3a   :  { %488 = vmatprep.subr.bf16.mxu0 %v647_v0 }
  0x3b   :  { %p620_p9 = por %p619_p8, %p618_p7 }
  0x3c   :  { %471 = vmatpush3.bf16.msra.mxu1 %v519_v5 }
  0x3d   :  { %472 = vmatprep.subr.bf16.mxu1 %v647_v0  ;;  %489 = vmatpush3.bf16.msra.mxu0 %v526_v12  ;;  %p621_p10 = pnand %p620_p9, %p614_p6 }
  0x3e   :  { %490 = vmatprep.subr.bf16.mxu0 %v647_v0 }
  0x40   :  { %473 = vmatpush3.bf16.msra.mxu1 %v520_v6 }
  0x41   :  { %474 = vmatprep.subr.bf16.mxu1 %v647_v0  ;;  %491 = vmatpush3.bf16.msra.mxu0 %v527_v13 }
  0x42   :  { %492 = vmatprep.subr.bf16.mxu0 %v647_v0 }
  0x44   :  { %475 = vmatpush3.bf16.msra.mxu1 %v521_v7 }
  0x45   :  { %476 = vmatprep.subr.bf16.mxu1 %v647_v0  ;;  %493 = vmatpush3.bf16.msra.mxu0 %v528_v14 }
  0x46   :  { %494 = vmatprep.subr.bf16.mxu0 %v647_v0 }
  0x48   :  { %477 = vmatpush3.bf16.msra.mxu1 %v522_v8 }
  0x49   :  { %478 = vmatprep.subr.bf16.mxu1 %v647_v0  ;;  %495 = vmatpush3.bf16.msra.mxu0 %v529_v15 }
  0x4a   :  { %496 = vmatprep.subr.bf16.mxu0 %v647_v0 }
  0x4c   :  { %479 = vmatpush3.bf16.msra.mxu1 %v523_v9 }
  0x4d   :  { %480 = vmatprep.subr.bf16.mxu1 %v647_v0  ;;  %497 = vmatpush3.bf16.msra.mxu0 %v530_v26 }
  0x4e   :  { %498 = vmatprep.subr.bf16.mxu0 %v647_v0 }
  0x50   :  { %481 = vmatpush3.bf16.msra.mxu1 %v524_v10 }
  0x51   :  { %499 = vmatpush3.bf16.msra.mxu0 %v531_v27 }
  0x52   :  { %500 = vmatprep.subr.bf16.mxu0 %v647_v0 }
  0x55   :  { %501 = vmatpush3.bf16.msra.mxu0 %v532_v28 }
  0xf7   :  { %v143_v17 = vpop.f32.mrf.mxu0 }
  0xf8   :  { %v144_v19 = vadd.f32 %v409_v16, %v143_v17 }
  0xf9   :  { %v464_v18 = vpop.f32.mrf.mxu0 }
  0xfa   :  { %v150_v23 = vmax.f32 %v144_v19, 0.0 }
  0xfb   :  { %v146_v20 = vpop.f32.mrf.mxu0 }
  0xfc   :  { %v147_v21 = vadd.f32 %v409_v16, %v146_v20 }
  0xfd   :  { %v465_v22 = vpop.f32.mrf.mxu0 }
  0xfe   :  { %v151_v24 = vmax.f32 %v147_v21, 0.0 }
 0x100   :  { %v152_v25 = vpack.c.bf16 %v151_v24, %v150_v23 }
 0x102   :  { %483 = vmatmul.mubr.bf16.vlgmr.msra.gmra.mxu1 %v152_v25 }
 0x1c2   :  { %v258_v30 = vpop.f32.mrf.mxu1 }
 0x1c3   :  { %v259_v32 = vadd.f32 %v413_v29, %v258_v30 }
 0x1c4   :  { %v484_v31 = vpop.f32.mrf.mxu1 }
 0x1c5   :  { %v265_v36 = vmax.f32 %v259_v32, 0.0 }
 0x1c6   :  { %v261_v33 = vpop.f32.mrf.mxu1 }
 0x1c7   :  { %v262_v34 = vadd.f32 %v413_v29, %v261_v33 }
 0x1c8   :  { %v485_v35 = vpop.f32.mrf.mxu1 }
 0x1c9   :  { %v266_v37 = vmax.f32 %v262_v34, 0.0 }
 0x1cb   :  { %v267_v38 = vpack.c.bf16 %v266_v37, %v265_v36 }
 0x1cd   :  { %503 = vmatmul.mubr.bf16.vlgmr.msra.gmra.mxu0 %v267_v38 }
 0x28d   :  { %v373_v39 = vpop.f32.mrf.mxu0 }
 0x28e   :  { %v374_v43 = vadd.f32 %v422_v40, %v373_v39 }
 0x28f   :  { %v504_v41 = vpop.f32.mrf.mxu0 }
 0x291   :  { %v376_v42 = vpop.f32.mrf.mxu0 }
 0x292   :  { %v377_v44 = vadd.f32 %v422_v40, %v376_v42 }
 0x293   :  { %v505_v45 = vpop.f32.mrf.mxu0 }
 0x294   :  { %v438_v46 = vpack.c.bf16 %v377_v44, %v374_v43 }
 0x296   :  { %439 = vst [vmem:[#allocation10] sm:$0xff] %v438_v46  }
 0x297   :  { %624 = shalt.err (!%p621_p10)
}
 0x298   :  { %401 = dma.vmem_to_hbm [thread:$0]  %s396_s25, 128, %s756_s7, [#allocation4], %s643_s29, %s643_s29, %s644_s30  }
 0x299   :  { %639 = dma.done.wait [#allocation4], 128  }
 0x29a   :  { %640 = vsyncadd [#allocation4], 4294967168 }
 0x29b   :  { %405 = vsyncpa [#allocation3], 1 }
 0x29c   :  { %406 = vsyncpa [#allocation6], 1 }
 0x29d   :  { %407 = vsyncpa [#allocation9], 1 }
 0x29e   :  { %408 = vsyncpa [#allocation4], 1 }

</bundles_post_ra>
